<compile_context>
chip_gen: v7x
topology: tpu7x:2x2x1
jax: 0.10.0
libtpu: 0.0.40
codegen_flags: <defaults>
</compile_context>

<pallas_src>
import jax
import jax.numpy as jnp
from jax.experimental import pallas as pl
from jax.experimental.pallas import tpu as pltpu


def _ortho_partial_kernel(e_ref, out_ref):
    """Per N-tile partial of sum(E^T E) = sum_n (row_sum_n)^2.

    e_ref:   (tile_n, D) block of embeddings, native dtype (f32 / bf16 / ...).
    out_ref: (1, 1, 128) f32 block; the scalar partial replicated across lanes.
    """
    # Read at native width; cast in-register only for accurate accumulation.
    e = e_ref[...].astype(jnp.float32)

    # Row sums over the embedding (lane) dim — XLU cross-lane reduce.
    row_sum = jnp.sum(e, axis=1, keepdims=True)            # (tile_n, 1)

    # Sum of squared row sums for this tile.
    partial = jnp.sum(row_sum * row_sum, keepdims=True)    # (1, 1) f32

    # Lane-dense store of the per-tile partial.
    out_ref[...] = jnp.broadcast_to(partial[None], out_ref.shape)


def orthogonality_regularization(embeddings, scaler, *, tile_n=None):
    """embeddings: (N, D) float array. Returns scalar loss (float32)."""
    n, d = embeddings.shape
    itemsize = jnp.dtype(embeddings.dtype).itemsize

    if tile_n is None:
        # Target ~4 MiB per input block (double-buffered -> ~8 MiB, safely
        # under every generation's scoped-VMEM limit), capped at 2048 rows,
        # multiple of 8 sublanes, and never larger than (padded) N.
        target_bytes = 4 * 1024 * 1024
        cap = (target_bytes // max(d * itemsize, 1)) // 8 * 8
        cap = max(8, min(2048, cap))
        tile_n = min(cap, pl.cdiv(n, 8) * 8)
    tile_n = max(8, (tile_n // 8) * 8)

    # Zero-pad N up to a multiple of tile_n (zero rows contribute nothing).
    n_pad = pl.cdiv(n, tile_n) * tile_n
    x = embeddings
    if n_pad != n:
        x = jnp.pad(x, ((0, n_pad - n), (0, 0)))
    num_tiles = n_pad // tile_n

    partials = pl.pallas_call(
        _ortho_partial_kernel,
        out_shape=jax.ShapeDtypeStruct((num_tiles, 1, 128), jnp.float32),
        grid_spec=pltpu.PrefetchScalarGridSpec(
            num_scalar_prefetch=0,
            grid=(num_tiles,),
            in_specs=[pl.BlockSpec((tile_n, d), lambda t: (t, 0))],
            out_specs=pl.BlockSpec((1, 1, 128), lambda t: (t, 0, 0)),
        ),
        compiler_params=pltpu.CompilerParams(
            # Independent tiles -> megacore shards them across TCs on v7x.
            dimension_semantics=("parallel",),
            # Above v5e's 16 MiB default scoped limit; safe on v6e/v7x too.
            vmem_limit_bytes=32 * 1024 * 1024,
        ),
    )(x)

    # Tiny epilogue: sum(E^T E) = sum of partials; mean(E^T E - I) * scaler.
    gram_sum = jnp.sum(partials[:, 0, 0])
    loss = (gram_sum - jnp.float32(d)) / jnp.float32(d * d)
    return loss * jnp.asarray(scaler, dtype=jnp.float32)


def _reference(embeddings, scaler):
    e = embeddings.astype(jnp.float32)
    gram = e.T @ e
    d = gram.shape[0]
    return jnp.mean(gram - jnp.eye(d, dtype=jnp.float32)) * scaler


if __name__ == "__main__":
    key = jax.random.PRNGKey(0)
    N, D = 16, 32           # small (N, D) embeddings consistent with the module
    scaler = 0.1            # deterministic "parameter" from the module __init__

    embeddings = jax.random.normal(key, (N, D), dtype=jnp.float32)

    loss = orthogonality_regularization(embeddings, scaler)
    loss = jax.block_until_ready(loss)

    ref = _reference(embeddings, scaler)
    assert jnp.allclose(loss, ref, rtol=1e-5, atol=1e-5), (loss, ref)

    print("KERNEL_OK")
</pallas_src>

<mosaic_0001>
module attributes {stable_mosaic.version = 11 : i64} {
  func.func @_ortho_partial_kernel(%arg0: i32, %arg1: memref<16x32xf32, #tpu.memory_space<vmem>>, %arg2: memref<1x1x128xf32, #tpu.memory_space<vmem>>) attributes {dimension_semantics = [#tpu.dimension_semantics<parallel>], iteration_bounds = array<i64: 1>, scalar_prefetch = 0 : i64, scratch_operands = 0 : i64, tpu.core_type = #tpu.core_type<tc>, window_params = [{transform_indices = @transform_0, window_bounds = array<i64: 16, 32>}, {transform_indices = @transform_1, window_bounds = array<i64: 1, 1, 128>}]} {
    %c0 = arith.constant 0 : index
    %c0_0 = arith.constant 0 : index
    %0 = vector.load %arg1[%c0, %c0_0] : memref<16x32xf32, #tpu.memory_space<vmem>>, vector<16x32xf32>
    %cst = arith.constant dense<0.000000e+00> : vector<16xf32>
    %1 = vector.multi_reduction <add>, %0, %cst [1] : vector<16x32xf32> to vector<16xf32>
    %2 = vector.shape_cast %1 : vector<16xf32> to vector<16x1xf32>
    %3 = arith.mulf %2, %2 : vector<16x1xf32>
    %4 = vector.shape_cast %3 : vector<16x1xf32> to vector<1x16x1xf32>
    %cst_1 = arith.constant dense<0.000000e+00> : vector<1xf32>
    %5 = vector.multi_reduction <add>, %4, %cst_1 [1, 2] : vector<1x16x1xf32> to vector<1xf32>
    %6 = vector.shape_cast %5 : vector<1xf32> to vector<1x1x1xf32>
    %7 = vector.extract %6[0, 0, 0] : f32 from vector<1x1x1xf32>
    %8 = vector.broadcast %7 : f32 to vector<1x1xf32>
    %9 = vector.shape_cast %8 : vector<1x1xf32> to vector<1x1x1xf32>
    %10 = vector.shape_cast %9 : vector<1x1x1xf32> to vector<1x1x1xf32>
    %11 = vector.broadcast %10 : vector<1x1x1xf32> to vector<1x1x128xf32>
    %c0_2 = arith.constant 0 : index
    %c0_3 = arith.constant 0 : index
    %c0_4 = arith.constant 0 : index
    %12 = vector.load %arg2[%c0_2, %c0_3, %c0_4] : memref<1x1x128xf32, #tpu.memory_space<vmem>>, vector<1x1x128xf32>
    tpu.vector_store %arg2[%c0_2, %c0_3, %c0_4], %11 {strides = array<i32>} : memref<1x1x128xf32, #tpu.memory_space<vmem>>, vector<1x1x128xf32>,
    return
  }
  func.func @transform_0(%arg0: i32) -> (i32, i32) {
    %c0_i32 = arith.constant 0 : i32
    %c0_i32_0 = arith.constant 0 : i32
    return %arg0, %c0_i32 : i32, i32
  }
  func.func @transform_1(%arg0: i32) -> (i32, i32, i32) {
    %c0_i32 = arith.constant 0 : i32
    %c0_i32_0 = arith.constant 0 : i32
    %c0_i32_1 = arith.constant 0 : i32
    return %arg0, %c0_i32, %c0_i32_0 : i32, i32, i32
  }
}

</mosaic_0001>

<bundles_post_ra>
// kernel: tpu_custom_call.1
= control target key start
LH: loop header
LB: loop body
LE: loop exit
PB: predicated region body
PF: predicated region fallthrough
CT: control target
= control target key end

     0   :  { %6 = vsyncpa [#allocation3], 0  ;;  %s156_s0 = inlined_call_operand.hbm [shape: f32[16,32], index: 0, kind: input, shape index: {}]   ;;  %s157_s1 = inlined_call_operand.hbm [shape: f32[1,1,128], index: 1, kind: output, shape index: {}]  }
   0x1   :  { %7 = vsyncpa [#allocation4], 0  ;;  %s118_s6 = smov [#allocation2]   ;;  %s70_s10 = scalar_lea.hbm %s156_s0, 256 }
   0x2   :  { %s13_s7 = sshll.u32 %s118_s6, 4  ;;  %p71_p0 = scmp.ne.s32.totalorder %s156_s0, %s70_s10  ;;  %s14_s7 = int_to_ptr.vmem [resolvable:$true] %s13_s7 }
   0x3   :  { %p74_p1 = scmp.lt.u32.totalorder %s70_s10, %s156_s0 }
   0x5   :  { %p76_p2 = pnand %p74_p1, %p71_p0 }
   0x7   :  { %79 = shalt.err (!%p76_p2)
}
   0x8   :  { %s80_s15 = scalar_lea.vmem %s14_s7, 256  ;;  %p85_p4 = scmp.lt.s32.totalorder %s14_s7, %s14_s7 }
   0x9   :  { %p81_p3 = scmp.ne.s32.totalorder %s14_s7, %s80_s15  ;;  %p86_p5 = scmp.lt.s32.totalorder %s80_s15, %s80_s15 }
   0xb   :  { %p87_p6 = por %p86_p5, %p85_p4 }
   0xd   :  { %p88_p7 = pnand %p87_p6, %p81_p3 }
   0xf   :  { %91 = shalt.err (!%p88_p7)
}
  0x10   :  { %s119_s16 = smov 128   ;;  %s120_s17 = smov 8  }
  0x11   :  { %19 = dma.hbm_to_vmem [thread:$0]  %s156_s0, 256, %s14_s7, [#allocation3], %s119_s16, %s119_s16, %s120_s17  }
  0x12   :  { %114 = dma.done.wait [#allocation3], 256  }
  0x13   :  { %115 = vsyncadd [#allocation3], 4294967040  ;;  %vm25_vm0 = vcmask 261120   ;;  %v23_v0 = vld [vmem:[#allocation2] sm:$0xff]  ;;  %v24_v1 = vld [vmem:[#allocation2 + $0x8] sm:$0xff]  ;;  %vm34_vm1 = vcmask 7168  }
  0x14   :  { %v26_v2 = vsel %vm25_vm0, %v23_v0, 0.0  ;;  %v29_v3 = vsel %vm25_vm0, %v24_v1, 0.0  ;;  %s121_s0 = smov [#allocation5]  }
  0x15   :  { %27 = vadd.xlane.f32.xlu0 %v26_v2  ;;  %s55_s20 = sshll.u32 %s121_s0, 4  ;;  %s56_s20 = int_to_ptr.vmem [resolvable:$true] %s55_s20 }
  0x16   :  { %s92_s22 = scalar_lea.vmem %s56_s20, 16  ;;  %s96_s23 = scalar_lea.vmem %s56_s20, 32 }
  0x17   :  { %p93_p8 = scmp.ne.s32.totalorder %s56_s20, %s92_s22  ;;  %p97_p9 = scmp.lt.s32.totalorder %s56_s20, %s56_s20 }
  0x18   :  { %p98_p10 = scmp.lt.s32.totalorder %s96_s23, %s92_s22 }
  0x19   :  { %30 = vadd.xlane.f32.xlu0 %v29_v3 }
  0x1a   :  { %p99_p11 = por %p98_p10, %p97_p9 }
  0x1c   :  { %p100_p12 = pnand %p99_p11, %p93_p8 }
  0xa2   :  { %v28_v4 = vpop.xlane.xlu0 %27 }
  0xa3   :  { %v32_v5 = vmul.f32 %v28_v4, %v28_v4 }
  0xa5   :  { %v35_v8 = vsel %vm34_vm1, %v32_v5, 0.0 }
  0xa6   :  { %v31_v6 = vpop.xlane.xlu0 %30 }
  0xa7   :  { %v33_v7 = vmul.f32 %v31_v6, %v31_v6 }
  0xa9   :  { %v36_v9 = vsel %vm34_vm1, %v33_v7, 0.0 }
  0xaa   :  { %v37_v10 = vadd.f32 %v36_v9, %v35_v8 }
  0xac   :  { %38 = vadd.xlane.f32.xlu1 %v37_v10 }
 0x139   :  { %v39_v11 = vpop.xlane.xlu1 %38 }
 0x13a   :  { %v40_v12 = vrot.slane %v39_v11, 4 }
 0x13c   :  { %v41_v13 = vadd.f32 %v40_v12, %v39_v11 }
 0x13e   :  { %v42_v14 = vrot.slane %v41_v13, 2 }
 0x140   :  { %v43_v15 = vadd.f32 %v42_v14, %v41_v13 }
 0x142   :  { %v44_v16 = vrot.slane %v43_v15, 1 }
 0x144   :  { %v45_v17 = vadd.f32 %v44_v16, %v43_v15 }
 0x146   :  { %64 = vpush %v45_v17 }
 0x177   :  { %s65_s21 = spop %64 }
 0x178   :  { %v47_v18 = vstv %s65_s21 }
 0x179   :  { %48 = vst [vmem:[#allocation5] sm:$0x1] %v47_v18 }
 0x17a   :  { %103 = shalt.err (!%p100_p12)
}
 0x17b   :  { %s104_s26 = scalar_lea.hbm %s157_s1, 16 }
 0x17c   :  { %p105_p13 = scmp.ne.s32.totalorder %s157_s1, %s104_s26  ;;  %p108_p0 = scmp.lt.u32.totalorder %s104_s26, %s157_s1 }
 0x17e   :  { %p110_p1 = pnand %p108_p0, %p105_p13 }
 0x180   :  { %113 = shalt.err (!%p110_p1)
}
 0x181   :  { %58 = dma.vmem_to_hbm [thread:$0]  %s56_s20, 16, %s157_s1, [#allocation4]  }
 0x182   :  { %116 = dma.done.wait [#allocation4], 16  }
 0x183   :  { %117 = vsyncadd [#allocation4], 4294967280 }
 0x184   :  { %62 = vsyncpa [#allocation3], 1 }
 0x185   :  { %63 = vsyncpa [#allocation4], 1 }

</bundles_post_ra>
